<compile_context>
chip_gen: v6e
topology: v6e:2x2x1
jax: 0.10.0
libtpu: 0.0.40
codegen_flags: <defaults>
</compile_context>

<pallas_src>
import functools

import jax
import jax.numpy as jnp
from jax.experimental import pallas as pl
from jax.experimental.pallas import tpu as pltpu


def _code_predictor_kernel(feat_ref, w_ref, b_ref, out_ref, *, n_shape):
    """Fused CodePredictor forward for one row tile.

    feat_ref: [TB, nz]      input features (VMEM)
    w_ref   : [nz, D_PAD]   fused weights; cols = shape | scale | quat | trans | 0-pad
    b_ref   : [1, D_PAD]    fused bias (zero in padding lanes)
    out_ref : [TB, D_PAD]   single lane-dense fused output tile
    """
    feat = feat_ref[...]
    # One MXU pass, f32 accumulation; bias add on the VPU.
    out = jnp.dot(feat, w_ref[...], preferred_element_type=jnp.float32) + b_ref[...]

    col = jax.lax.broadcasted_iota(jnp.int32, out.shape, 1)

    # --- ScalePredictor lane (col == n_shape): relu(x + 1) + 1e-12 ---
    is_scale = col == n_shape
    scale_vals = jnp.maximum(out + 1.0, 0.0) + 1e-12

    # --- QuatPredictor lanes (n_shape+1 .. n_shape+4):
    #     F.normalize: q / max(||q||_2, 1e-12) == q * rsqrt(max(||q||^2, 1e-24)) ---
    is_quat = (col >= n_shape + 1) & (col < n_shape + 5)
    q_masked = jnp.where(is_quat, out, 0.0)
    sumsq = jnp.sum(q_masked * q_masked, axis=-1, keepdims=True)     # XLU reduce
    inv_norm = jax.lax.rsqrt(jnp.maximum(sumsq, 1e-24))              # EUP, not VPU divide
    quat_vals = out * inv_norm

    # Shape / Trans lanes (and the zero padding lanes) pass through untouched.
    fused = jnp.where(is_quat, quat_vals, jnp.where(is_scale, scale_vals, out))

    # Single lane-dense, unmasked store.
    out_ref[...] = fused.astype(out_ref.dtype)


def fuse_code_predictor_params(params, n_kp, lane=128):
    """Pre-fuse + pre-transpose the four Linear heads ONCE (not per forward).

    PyTorch Linear is y = x @ W.T + b with W [out, in]; we store the fused,
    transposed, lane-padded W [nz, D_PAD] and b [1, D_PAD] (zero padding)."""
    d_shape = n_kp * 3
    d_logical = d_shape + 1 + 4 + 2
    d_pad = lane * (-(-d_logical // lane))   # ceil to a multiple of 128

    w = jnp.concatenate(
        [params["shape_w"].T,   # [nz, n_kp*3]
         params["scale_w"].T,   # [nz, 1]
         params["quat_w"].T,    # [nz, 4]
         params["trans_w"].T],  # [nz, 2]
        axis=1)
    b = jnp.concatenate(
        [params["shape_b"], params["scale_b"], params["quat_b"], params["trans_b"]],
        axis=0)

    nz = w.shape[0]
    w_fused = jnp.zeros((nz, d_pad), jnp.float32).at[:, :d_logical].set(w)
    b_fused = jnp.zeros((1, d_pad), jnp.float32).at[0, :d_logical].set(b)
    return w_fused, b_fused


@functools.partial(jax.jit, static_argnames=("n_kp",))
def code_predictor_forward(feat, w_fused, b_fused, *, n_kp):
    """feat [B, nz] -> (shape [B,n_kp,3], scale [B,1], trans [B,2], quat [B,4])."""
    B, nz = feat.shape
    d_shape = n_kp * 3
    d_pad = w_fused.shape[1]

    # Sublane-align the batch; row-tile large batches across a parallel grid
    # so v7x's second TensorCore shares the work.  For small B: grid == (1,).
    b_pad = -(-B // 8) * 8
    if b_pad <= 1024:
        tb = b_pad
    else:
        tb = 512
        b_pad = -(-b_pad // tb) * tb

    feat_p = feat if b_pad == B else jnp.pad(feat, ((0, b_pad - B), (0, 0)))
    grid = (b_pad // tb,)

    fused = pl.pallas_call(
        functools.partial(_code_predictor_kernel, n_shape=d_shape),
        out_shape=jax.ShapeDtypeStruct((b_pad, d_pad), jnp.float32),
        grid=grid,
        in_specs=[
            pl.BlockSpec((tb, nz), lambda i: (i, 0)),
            pl.BlockSpec((nz, d_pad), lambda i: (0, 0)),
            pl.BlockSpec((1, d_pad), lambda i: (0, 0)),
        ],
        out_specs=pl.BlockSpec((tb, d_pad), lambda i: (i, 0)),
        compiler_params=pltpu.CompilerParams(
            dimension_semantics=("parallel",)),
    )(feat_p, w_fused, b_fused)

    # Slice the heads out of the single lane-dense block (cheap XLA slices).
    fused = fused[:B]
    shape_pred = fused[:, :d_shape].reshape(B, n_kp, 3)
    scale_pred = fused[:, d_shape:d_shape + 1]
    quat_pred = fused[:, d_shape + 1:d_shape + 5]
    trans_pred = fused[:, d_shape + 5:d_shape + 7]
    # PyTorch CodePredictor return order: (shape, scale, trans, quat).
    return shape_pred, scale_pred, trans_pred, quat_pred


def init_params(key, nz_feat, n_kp):
    """Deterministic synthetic params (shapes follow the nn.Module __init__)."""
    ks = jax.random.split(key, 8)

    def linear_init(kw, kb, out_f, in_f, std=None):
        bound = 1.0 / jnp.sqrt(in_f)
        if std is None:
            w = jax.random.uniform(kw, (out_f, in_f), jnp.float32, -bound, bound)
        else:
            # ShapePredictor: weight.data.normal_(0, 0.0001)
            w = std * jax.random.normal(kw, (out_f, in_f), jnp.float32)
        b = jax.random.uniform(kb, (out_f,), jnp.float32, -bound, bound)
        return w, b

    shape_w, shape_b = linear_init(ks[0], ks[1], n_kp * 3, nz_feat, std=1e-4)
    scale_w, scale_b = linear_init(ks[2], ks[3], 1, nz_feat)
    quat_w, quat_b = linear_init(ks[4], ks[5], 4, nz_feat)
    trans_w, trans_b = linear_init(ks[6], ks[7], 2, nz_feat)

    return dict(shape_w=shape_w, shape_b=shape_b,
                scale_w=scale_w, scale_b=scale_b,
                quat_w=quat_w, quat_b=quat_b,
                trans_w=trans_w, trans_b=trans_b)


if __name__ == "__main__":
    # B=8 gives a full (8,128) output tile; nz_feat/n_kp kept small and
    # consistent with the module.
    B, nz_feat, n_kp = 8, 32, 8

    key = jax.random.PRNGKey(0)
    k_feat, k_params = jax.random.split(key)
    feat = jax.random.normal(k_feat, (B, nz_feat), jnp.float32)
    params = init_params(k_params, nz_feat, n_kp)

    # Fuse / transpose / lane-pad the head weights ONCE (hoisted out of forward).
    w_fused, b_fused = fuse_code_predictor_params(params, n_kp)

    outs = code_predictor_forward(feat, w_fused, b_fused, n_kp=n_kp)
    shape_pred, scale_pred, trans_pred, quat_pred = jax.block_until_ready(outs)

    # Reference check in plain JAX (same semantics as the PyTorch module).
    def ref(feat, p):
        sh = (feat @ p["shape_w"].T + p["shape_b"]).reshape(B, n_kp, 3)
        sc = jnp.maximum(feat @ p["scale_w"].T + p["scale_b"] + 1.0, 0.0) + 1e-12
        q = feat @ p["quat_w"].T + p["quat_b"]
        q = q / jnp.maximum(jnp.linalg.norm(q, axis=1, keepdims=True), 1e-12)
        tr = feat @ p["trans_w"].T + p["trans_b"]
        return sh, sc, tr, q

    r_sh, r_sc, r_tr, r_q = ref(feat, params)
    assert jnp.allclose(shape_pred, r_sh, atol=1e-5)
    assert jnp.allclose(scale_pred, r_sc, atol=1e-5)
    assert jnp.allclose(trans_pred, r_tr, atol=1e-5)
    assert jnp.allclose(quat_pred, r_q, atol=1e-5)

    assert shape_pred.shape == (B, n_kp, 3)
    assert scale_pred.shape == (B, 1)
    assert trans_pred.shape == (B, 2)
    assert quat_pred.shape == (B, 4)

    print("KERNEL_OK")
</pallas_src>

<mosaic_0001>
module attributes {stable_mosaic.version = 11 : i64} {
  func.func @_code_predictor_kernel(%arg0: i32, %arg1: memref<8x32xf32, #tpu.memory_space<vmem>>, %arg2: memref<32x128xf32, #tpu.memory_space<vmem>>, %arg3: memref<1x128xf32, #tpu.memory_space<vmem>>, %arg4: memref<8x128xf32, #tpu.memory_space<vmem>>) attributes {dimension_semantics = [#tpu.dimension_semantics<parallel>], iteration_bounds = array<i64: 1>, scalar_prefetch = 0 : i64, scratch_operands = 0 : i64, tpu.core_type = #tpu.core_type<tc>, window_params = [{transform_indices = @transform_0, window_bounds = array<i64: 8, 32>}, {pipeline_mode = #tpu.pipeline_mode<synchronous>, transform_indices = @transform_1, window_bounds = array<i64: 32, 128>}, {pipeline_mode = #tpu.pipeline_mode<synchronous>, transform_indices = @transform_2, window_bounds = array<i64: 1, 128>}, {transform_indices = @transform_3, window_bounds = array<i64: 8, 128>}]} {
    %c0 = arith.constant 0 : index
    %c0_0 = arith.constant 0 : index
    %0 = vector.load %arg1[%c0, %c0_0] : memref<8x32xf32, #tpu.memory_space<vmem>>, vector<8x32xf32>
    %c0_1 = arith.constant 0 : index
    %c0_2 = arith.constant 0 : index
    %1 = vector.load %arg2[%c0_1, %c0_2] : memref<32x128xf32, #tpu.memory_space<vmem>>, vector<32x128xf32>
    %cst = arith.constant dense<0.000000e+00> : vector<8x128xf32>
    %2 = tpu.matmul %0, %1, %cst {dimension_numbers = #tpu.dot_dimension_numbers<[1], [0], [0], [1], [0, 0, 1, 1], [], []>} : vector<8x32xf32>, vector<32x128xf32>, vector<8x128xf32> -> vector<8x128xf32>
    %c0_3 = arith.constant 0 : index
    %c0_4 = arith.constant 0 : index
    %3 = vector.load %arg3[%c0_3, %c0_4] : memref<1x128xf32, #tpu.memory_space<vmem>>, vector<1x128xf32>
    %4 = vector.broadcast %3 : vector<1x128xf32> to vector<8x128xf32>
    %5 = arith.addf %2, %4 : vector<8x128xf32>
    %6 = tpu.iota {dimensions = array<i32: 1>} : vector<8x128xi32>
    %c24_i32 = arith.constant 24 : i32
    %7 = vector.broadcast %c24_i32 : i32 to vector<8x128xi32>
    %8 = arith.cmpi eq, %6, %7 : vector<8x128xi32>
    %cst_5 = arith.constant 1.000000e+00 : f32
    %9 = vector.broadcast %cst_5 : f32 to vector<8x128xf32>
    %10 = arith.addf %5, %9 : vector<8x128xf32>
    %cst_6 = arith.constant 0.000000e+00 : f32
    %11 = vector.broadcast %cst_6 : f32 to vector<8x128xf32>
    %12 = arith.maximumf %10, %11 : vector<8x128xf32>
    %cst_7 = arith.constant 9.99999996E-13 : f32
    %13 = vector.broadcast %cst_7 : f32 to vector<8x128xf32>
    %14 = arith.addf %12, %13 : vector<8x128xf32>
    %c25_i32 = arith.constant 25 : i32
    %15 = vector.broadcast %c25_i32 : i32 to vector<8x128xi32>
    %16 = arith.cmpi sge, %6, %15 : vector<8x128xi32>
    %c29_i32 = arith.constant 29 : i32
    %17 = vector.broadcast %c29_i32 : i32 to vector<8x128xi32>
    %18 = arith.cmpi slt, %6, %17 : vector<8x128xi32>
    %19 = arith.andi %16, %18 : vector<8x128xi1>
    %cst_8 = arith.constant 0.000000e+00 : f32
    %20 = vector.broadcast %cst_8 : f32 to vector<8x128xf32>
    %21 = arith.select %19, %5, %20 : vector<8x128xi1>, vector<8x128xf32>
    %22 = arith.mulf %21, %21 : vector<8x128xf32>
    %cst_9 = arith.constant dense<0.000000e+00> : vector<8xf32>
    %23 = vector.multi_reduction <add>, %22, %cst_9 [1] : vector<8x128xf32> to vector<8xf32>
    %24 = vector.shape_cast %23 : vector<8xf32> to vector<8x1xf32>
    %cst_10 = arith.constant 1.000000e-24 : f32
    %25 = vector.broadcast %cst_10 : f32 to vector<8x1xf32>
    %26 = arith.maximumf %24, %25 : vector<8x1xf32>
    %27 = math.rsqrt %26 : vector<8x1xf32>
    %28 = vector.broadcast %27 : vector<8x1xf32> to vector<8x128xf32>
    %29 = arith.mulf %5, %28 : vector<8x128xf32>
    %30 = arith.select %8, %14, %5 : vector<8x128xi1>, vector<8x128xf32>
    %31 = arith.select %19, %29, %30 : vector<8x128xi1>, vector<8x128xf32>
    %c0_11 = arith.constant 0 : index
    %c0_12 = arith.constant 0 : index
    %32 = vector.load %arg4[%c0_11, %c0_12] : memref<8x128xf32, #tpu.memory_space<vmem>>, vector<8x128xf32>
    tpu.vector_store %arg4[%c0_11, %c0_12], %31 {strides = array<i32>} : memref<8x128xf32, #tpu.memory_space<vmem>>, vector<8x128xf32>,
    return
  }
  func.func @transform_0(%arg0: i32) -> (i32, i32) {
    %c0_i32 = arith.constant 0 : i32
    %c0_i32_0 = arith.constant 0 : i32
    return %arg0, %c0_i32 : i32, i32
  }
  func.func @transform_1(%arg0: i32) -> (i32, i32) {
    %c0_i32 = arith.constant 0 : i32
    %c0_i32_0 = arith.constant 0 : i32
    %c0_i32_1 = arith.constant 0 : i32
    return %c0_i32, %c0_i32_0 : i32, i32
  }
  func.func @transform_2(%arg0: i32) -> (i32, i32) {
    %c0_i32 = arith.constant 0 : i32
    %c0_i32_0 = arith.constant 0 : i32
    %c0_i32_1 = arith.constant 0 : i32
    return %c0_i32, %c0_i32_0 : i32, i32
  }
  func.func @transform_3(%arg0: i32) -> (i32, i32) {
    %c0_i32 = arith.constant 0 : i32
    %c0_i32_0 = arith.constant 0 : i32
    return %arg0, %c0_i32 : i32, i32
  }
}

</mosaic_0001>

<bundles_post_ra>
// kernel: code_predictor_forward.1
= control target key start
LH: loop header
LB: loop body
LE: loop exit
PB: predicated region body
PF: predicated region fallthrough
CT: control target
= control target key end

     0   :  { %8 = vsyncpa [#allocation3], 0  ;;  %s267_s0 = inlined_call_operand.hbm [shape: f32[8,32], index: 0, kind: input, shape index: {}]   ;;  %s268_s1 = inlined_call_operand.hbm [shape: f32[32,128], index: 1, kind: input, shape index: {}]   ;;  %s269_s2 = inlined_call_operand.vmem [shape: f32[1,128], index: 2, kind: input, shape index: {}]   ;;  %s270_s3 = inlined_call_operand.vmem [shape: f32[8,128], index: 3, kind: output, shape index: {}]  }
   0x1   :  { %9 = vsyncpa [#allocation5], 0  ;;  %s221_s12 = smov [#allocation2]   ;;  %s222_s14 = smov [#allocation4]  }
   0x2   :  { %s16_s13 = sshll.u32 %s221_s12, 4  ;;  %s25_s15 = sshll.u32 %s222_s14, 4  ;;  %s17_s13 = int_to_ptr.vmem [resolvable:$true] %s16_s13  ;;  %s26_s15 = int_to_ptr.vmem [resolvable:$true] %s25_s15 }
   0x3   :  { %s185_s16 = scalar_lea.vmem %s17_s13, 128  ;;  %p190_p1 = scmp.lt.s32.totalorder %s17_s13, %s17_s13 }
   0x4   :  { %p186_p0 = scmp.ne.s32.totalorder %s17_s13, %s185_s16  ;;  %p191_p2 = scmp.lt.s32.totalorder %s185_s16, %s185_s16 }
   0x6   :  { %p192_p3 = por %p191_p2, %p190_p1 }
   0x8   :  { %p193_p4 = pnand %p192_p3, %p186_p0 }
   0xa   :  { %196 = shalt.err (!%p193_p4)
}
   0xb   :  { %19 = dma.hbm_to_vmem [thread:$0]  %s267_s0, 128, %s17_s13, [#allocation3]  }
   0xc   :  { %s205_s19 = scalar_lea.vmem %s26_s15, 512  ;;  %p210_p6 = scmp.lt.s32.totalorder %s26_s15, %s26_s15 }
   0xd   :  { %p206_p5 = scmp.ne.s32.totalorder %s26_s15, %s205_s19  ;;  %p211_p7 = scmp.lt.s32.totalorder %s205_s19, %s205_s19 }
   0xf   :  { %p212_p8 = por %p211_p7, %p210_p6 }
  0x11   :  { %p213_p9 = pnand %p212_p8, %p206_p5 }
  0x13   :  { %216 = shalt.err (!%p213_p9)
}
  0x14   :  { %s223_s20 = smov 128   ;;  %s224_s21 = smov 8  }
  0x15   :  { %31 = dma.hbm_to_vmem [thread:$0]  %s268_s1, 512, %s26_s15, [#allocation5], %s223_s20, %s223_s20, %s224_s21  }
  0x16   :  { %217 = dma.done.wait [#allocation3], 128  }
  0x17   :  { %218 = vsyncadd [#allocation3], 4294967168 }
  0x18   :  { %219 = dma.done.wait [#allocation5], 512  }
  0x19   :  { %220 = vsyncadd [#allocation5], 4294966784  ;;  %v225_v0 = vmov 0.0   ;;  %vm226_vm0 = vmmov 0   ;;  %v44_v1 = vld [vmem:[#allocation4 + $0x18] sm:$0xff]  ;;  %v43_v2 = vld [vmem:[#allocation4 + $0x10] sm:$0xff]  ;;  %v126_v6 = vlaneseq }
  0x1a   :  { %158 = vmatprep.subr.mxu0 %v225_v0  ;;  %166 = vmatprep.mubr.msk.f32.mxu0 %vm226_vm0, %v225_v0  ;;  %v42_v3 = vld [vmem:[#allocation4 + $0x8] sm:$0xff]  ;;  %v41_v4 = vld [vmem:[#allocation4] sm:$0xff]  ;;  %v40_v5 = vld [vmem:[#allocation2] sm:$0xff]  ;;  %vm52_vm1 = vcmask 261120  }
  0x1b   :  { %159 = vmatpush3.msra.mxu0 %v44_v1  ;;  %v127_v7 = vand.u32 127, %v126_v6  ;;  %v151_v8 = vld [vmem:[%s269_s2] ss:$0 sm:$0xff] }
  0x1c   :  { %160 = vmatprep.subr.mxu0 %v225_v0 }
  0x1d   :  { %161 = vmatpush3.msra.mxu0 %v43_v2  ;;  %vm132_vm2 = vcmp.ge.s32.totalorder %v127_v7, 25  ;;  %vm133_vm3 = vcmp.lt.s32.totalorder %v127_v7, 29  ;;  %vm128_vm5 = vcmp.eq.s32.totalorder %v127_v7, 24 }
  0x1e   :  { %162 = vmatprep.subr.mxu0 %v225_v0  ;;  %vm256_vm4 = vmand %vm132_vm2, %vm133_vm3 }
  0x1f   :  { %163 = vmatpush3.msra.mxu0 %v42_v3 }
  0x20   :  { %164 = vmatprep.subr.mxu0 %v225_v0 }
  0x21   :  { %165 = vmatpush3.msra.mxu0 %v41_v4 }
  0x22   :  { %167 = vmatmul.mubr.msk.f32.vlgmr.msra.gmra.mxu0 %vm52_vm1, %v40_v5 }
  0xe2   :  { %v122_v9 = vpop.f32.mrf.mxu0 }
  0xe3   :  { %v123_v11 = vadd.f32 %v151_v8, %v122_v9 }
  0xe4   :  { %v168_v12 = vpop.f32.mrf.mxu0 }
  0xe5   :  { %v135_v13 = vsel %vm256_vm4, %v123_v11, 0.0  ;;  %v129_v17 = vadd.f32 1.0, %v123_v11 }
  0xe6   :  { %v136_v14 = vmul.f32 %v135_v13, %v135_v13 }
  0xe7   :  { %v130_v18 = vmax.f32 %v129_v17, 0.0 }
  0xe8   :  { %137 = vadd.xlane.f32.xlu0 %v136_v14 }
  0xe9   :  { %v131_v19 = vadd.f32 1e-12, %v130_v18 }
  0xeb   :  { %v142_v22 = vsel %vm128_vm5, %v131_v19, %v123_v11 }
 0x171   :  { %v138_v15 = vpop.xlane.xlu0 %137 }
 0x172   :  { %v139_v16 = vmax.f32 %v138_v15, 1e-24 }
 0x174   :  { %175 = vrsqrt.f32 %v139_v16 }
 0x181   :  { %v176_v20 = vpop.eup %175 }
 0x182   :  { %v141_v21 = vmul.f32 %v176_v20, %v123_v11 }
 0x184   :  { %v143_v23 = vsel %vm256_vm4, %v141_v21, %v142_v22 }
 0x185   :  { %144 = vst [vmem:[%s270_s3] sm:$0xff] %v143_v23 }
 0x186   :  { %149 = vsyncpa [#allocation3], 1 }
 0x187   :  { %150 = vsyncpa [#allocation5], 1 }

</bundles_post_ra>
